<compile_context>
chip_gen: v7x
topology: tpu7x:2x2x1
jax: 0.10.0
libtpu: 0.0.40
codegen_flags: <defaults>
</compile_context>

<pallas_src>
import jax
import jax.numpy as jnp
from jax.experimental import pallas as pl
from jax.experimental.pallas import tpu as pltpu


def _stochastic_relu_kernel(x_ref, scale_ref, o_ref):
    """Elementwise: out = where(x < 0, -scale * x, x)."""
    x = x_ref[...].astype(jnp.float32)       # (TILE_ROWS, COLS)
    scale = scale_ref[...]                   # (1, 1) -> broadcasts over the tile
    out = jnp.where(x < 0.0, -scale * x, x)
    o_ref[...] = out.astype(o_ref.dtype)


def stochastic_relu(x, scale, *, cols=512, max_tile_rows=512):
    """Eval-mode StochasticRelu. `x`: any shape/dtype; `scale`: scalar parameter."""
    assert cols % 128 == 0, "lane axis must be a multiple of 128"
    assert max_tile_rows % 8 == 0, "row tile must be a multiple of 8 sublanes"

    orig_shape = x.shape
    n = x.size

    # Lane-dense 2D view: last dim = `cols` (multiple of 128 -> unmasked stores);
    # rows padded to a multiple of 8 sublanes and to a whole number of row tiles.
    rows = pl.cdiv(n, cols)
    rows = ((rows + 7) // 8) * 8
    tile_rows = min(max_tile_rows, rows)
    rows = pl.cdiv(rows, tile_rows) * tile_rows
    n_pad = rows * cols

    xf = x.reshape(-1)
    if n_pad != n:
        xf = jnp.pad(xf, (0, n_pad - n))
    x2 = xf.reshape(rows, cols)

    scale_arr = jnp.asarray(scale, dtype=jnp.float32).reshape(1, 1)

    grid = rows // tile_rows
    itemsize = x2.dtype.itemsize
    tile_bytes = tile_rows * cols * itemsize
    # in + out tiles, double-buffered, plus headroom; 16 MiB floor is safe on v5e.
    vmem_limit = int(min(100 << 20, max(16 << 20, 6 * tile_bytes)))

    cost = pl.CostEstimate(
        flops=int(3 * n_pad),                       # compare + mul + select per element
        transcendentals=0,
        bytes_accessed=int(2 * n_pad * itemsize + 4))

    out = pl.pallas_call(
        _stochastic_relu_kernel,
        out_shape=jax.ShapeDtypeStruct((rows, cols), x.dtype),
        grid_spec=pltpu.PrefetchScalarGridSpec(
            num_scalar_prefetch=0,
            grid=(grid,),
            in_specs=[
                pl.BlockSpec((tile_rows, cols), lambda i: (i, 0)),   # x row tile
                pl.BlockSpec((1, 1), lambda i: (0, 0)),              # scale (resident)
            ],
            out_specs=pl.BlockSpec((tile_rows, cols), lambda i: (i, 0)),
        ),
        compiler_params=pltpu.CompilerParams(
            dimension_semantics=("parallel",),
            vmem_limit_bytes=vmem_limit),
        cost_estimate=cost,
    )(x2, scale_arr)

    return out.reshape(-1)[:n].reshape(orig_shape)


def _reference(x, scale):
    noise = -x * jnp.float32(scale)
    return (x < 0) * noise + jnp.maximum(x, 0.0)


if __name__ == "__main__":
    # Small shapes consistent with an elementwise activation: batch=2, channels=4, 16x16 spatial.
    B, C, H, W = 2, 4, 16, 16
    key = jax.random.PRNGKey(0)
    kx, ky = jax.random.split(key)

    x = jax.random.normal(kx, (B, C, H, W), dtype=jnp.float32)
    scale = 0.25   # nonzero so the negative branch is actually exercised

    out = jax.block_until_ready(stochastic_relu(x, scale))
    ref = _reference(x, scale)
    assert out.shape == x.shape
    assert jnp.allclose(out, ref, atol=1e-6, rtol=1e-6), "mismatch vs reference"

    # Odd, non-tile-aligned shape exercises the pad/unpad path; scale=0 (module default) == ReLU.
    x2 = jax.random.normal(ky, (3, 5, 7), dtype=jnp.float32)
    out2 = jax.block_until_ready(stochastic_relu(x2, 0.0))
    ref2 = _reference(x2, 0.0)
    assert jnp.allclose(out2, ref2, atol=1e-6, rtol=1e-6), "mismatch (scale=0 / ReLU)"

    print("KERNEL_OK")
</pallas_src>

<mosaic_0001>
module attributes {stable_mosaic.version = 11 : i64} {
  func.func @_stochastic_relu_kernel(%arg0: i32, %arg1: memref<8x512xf32, #tpu.memory_space<vmem>>, %arg2: memref<1x1xf32, #tpu.memory_space<vmem>>, %arg3: memref<8x512xf32, #tpu.memory_space<vmem>>) attributes {dimension_semantics = [#tpu.dimension_semantics<parallel>], iteration_bounds = array<i64: 1>, scalar_prefetch = 0 : i64, scratch_operands = 0 : i64, tpu.core_type = #tpu.core_type<tc>, window_params = [{transform_indices = @transform_0, window_bounds = array<i64: 8, 512>}, {pipeline_mode = #tpu.pipeline_mode<synchronous>, transform_indices = @transform_1, window_bounds = array<i64: 1, 1>}, {transform_indices = @transform_2, window_bounds = array<i64: 8, 512>}]} {
    %c0 = arith.constant 0 : index
    %c0_0 = arith.constant 0 : index
    %0 = vector.load %arg1[%c0, %c0_0] : memref<8x512xf32, #tpu.memory_space<vmem>>, vector<8x512xf32>
    %c0_1 = arith.constant 0 : index
    %c0_2 = arith.constant 0 : index
    %1 = vector.load %arg2[%c0_1, %c0_2] : memref<1x1xf32, #tpu.memory_space<vmem>>, vector<1x1xf32>
    %cst = arith.constant 0.000000e+00 : f32
    %2 = vector.broadcast %cst : f32 to vector<8x512xf32>
    %3 = arith.cmpf olt, %0, %2 : vector<8x512xf32>
    %cst_3 = arith.constant 0.000000e+00 : f32
    %4 = vector.broadcast %cst_3 : f32 to vector<1x1xf32>
    %5 = arith.subf %4, %1 : vector<1x1xf32>
    %6 = vector.broadcast %5 : vector<1x1xf32> to vector<8x512xf32>
    %7 = arith.mulf %6, %0 : vector<8x512xf32>
    %8 = arith.select %3, %7, %0 : vector<8x512xi1>, vector<8x512xf32>
    %c0_4 = arith.constant 0 : index
    %c0_5 = arith.constant 0 : index
    %9 = vector.load %arg3[%c0_4, %c0_5] : memref<8x512xf32, #tpu.memory_space<vmem>>, vector<8x512xf32>
    tpu.vector_store %arg3[%c0_4, %c0_5], %8 {strides = array<i32>} : memref<8x512xf32, #tpu.memory_space<vmem>>, vector<8x512xf32>,
    return
  }
  func.func @transform_0(%arg0: i32) -> (i32, i32) {
    %c0_i32 = arith.constant 0 : i32
    %c0_i32_0 = arith.constant 0 : i32
    return %arg0, %c0_i32 : i32, i32
  }
  func.func @transform_1(%arg0: i32) -> (i32, i32) {
    %c0_i32 = arith.constant 0 : i32
    %c0_i32_0 = arith.constant 0 : i32
    %c0_i32_1 = arith.constant 0 : i32
    return %c0_i32, %c0_i32_0 : i32, i32
  }
  func.func @transform_2(%arg0: i32) -> (i32, i32) {
    %c0_i32 = arith.constant 0 : i32
    %c0_i32_0 = arith.constant 0 : i32
    return %arg0, %c0_i32 : i32, i32
  }
}

</mosaic_0001>

<bundles_post_ra>
// kernel: tpu_custom_call.1
= control target key start
LH: loop header
LB: loop body
LE: loop exit
PB: predicated region body
PF: predicated region fallthrough
CT: control target
= control target key end

     0   :  { %s169_s0 = inlined_call_operand.hbm [shape: f32[8,512], index: 0, kind: input, shape index: {}]   ;;  %s170_s1 = inlined_call_operand.<no memory space> [shape: f32[1,1], index: 1, kind: input, shape index: {}]   ;;  %s171_s2 = inlined_call_operand.hbm [shape: f32[8,512], index: 2, kind: output, shape index: {}]  }
   0x1   :  { %v7_v0 = vstv %s170_s1 }
   0x2   :  { %8 = vst [vmem:[#allocation2] sm:$0x1] %v7_v0 }
   0x3   :  { %9 = vsyncpa [#allocation4], 0 }
   0x4   :  { %10 = vsyncpa [#allocation5], 0  ;;  %s124_s11 = smov [#allocation3]   ;;  %s76_s15 = scalar_lea.hbm %s169_s0, 512 }
   0x5   :  { %s17_s12 = sshll.u32 %s124_s11, 4  ;;  %p77_p0 = scmp.ne.s32.totalorder %s169_s0, %s76_s15  ;;  %s18_s12 = int_to_ptr.vmem [resolvable:$true] %s17_s12 }
   0x6   :  { %p80_p1 = scmp.lt.u32.totalorder %s76_s15, %s169_s0 }
   0x8   :  { %p82_p2 = pnand %p80_p1, %p77_p0 }
   0xa   :  { %85 = shalt.err (!%p82_p2)
}
   0xb   :  { %s86_s1 = scalar_lea.vmem %s18_s12, 512  ;;  %p91_p4 = scmp.lt.s32.totalorder %s18_s12, %s18_s12 }
   0xc   :  { %p87_p3 = scmp.ne.s32.totalorder %s18_s12, %s86_s1  ;;  %p92_p5 = scmp.lt.s32.totalorder %s86_s1, %s86_s1 }
   0xe   :  { %p93_p6 = por %p92_p5, %p91_p4 }
  0x10   :  { %p94_p7 = pnand %p93_p6, %p87_p3 }
  0x12   :  { %97 = shalt.err (!%p94_p7)
}
  0x13   :  { %20 = dma.hbm_to_vmem [thread:$0]  %s169_s0, 512, %s18_s12, [#allocation4]  }
  0x14   :  { %120 = dma.done.wait [#allocation4], 512  }
  0x15   :  { %121 = vsyncadd [#allocation4], 4294966784  ;;  %v37_v1 = vlaneseq  ;;  %v125_v2 = vmov 0   ;;  %v30_v5 = vld [vmem:[#allocation2] sm:$0x1]  ;;  %v26_v8 = vld [vmem:[#allocation3] sm:$0xff] }
  0x16   :  { %75 = vset.pattern.permute.xlu0 %v125_v2  ;;  %v35_v6 = vsub.f32 0.0, %v30_v5  ;;  %v27_v9 = vld [vmem:[#allocation3 + $0x8] sm:$0xff]  ;;  %v28_v10 = vld [vmem:[#allocation3 + $0x10] sm:$0xff]  ;;  %v29_v11 = vld [vmem:[#allocation3 + $0x18] sm:$0xff]  ;;  %s126_s22 = smov [#allocation6]   ;;  %vm31_vm0 = vcmp.lt.f32.partialorder %v26_v8, 0.0 }
  0x17   :  { %v38_v3 = vshrl.u32 %v37_v1, 7  ;;  %s63_s23 = sshll.u32 %s126_s22, 4  ;;  %vm32_vm1 = vcmp.lt.f32.partialorder %v27_v9, 0.0  ;;  %vm33_vm2 = vcmp.lt.f32.partialorder %v28_v10, 0.0  ;;  %vm34_vm3 = vcmp.lt.f32.partialorder %v29_v11, 0.0  ;;  %s64_s23 = int_to_ptr.vmem [resolvable:$true] %s63_s23 }
  0x18   :  { %s98_s0 = scalar_lea.vmem %s64_s23, 512  ;;  %p103_p9 = scmp.lt.s32.totalorder %s64_s23, %s64_s23 }
  0x19   :  { %v39_v4 = vsub.s32 0, %v38_v3  ;;  %p99_p8 = scmp.ne.s32.totalorder %s64_s23, %s98_s0  ;;  %p104_p10 = scmp.lt.s32.totalorder %s98_s0, %s98_s0 }
  0x1b   :  { %v40_v7 = vrot.slane %v35_v6, %v39_v4  ;;  %p105_p11 = por %p104_p10, %p103_p9 }
  0x1d   :  { %42 = vperm.xlu0 %75, %v40_v7   ;;  %p106_p12 = pnand %p105_p11, %p99_p8 }
  0x9c   :  { %v43_v12 = vpop.permute.xlu0 %42 }
  0x9d   :  { %v45_v13 = vmul.f32 %v43_v12, %v26_v8  ;;  %v46_v14 = vmul.f32 %v43_v12, %v27_v9  ;;  %v47_v15 = vmul.f32 %v43_v12, %v28_v10  ;;  %v48_v16 = vmul.f32 %v43_v12, %v29_v11 }
  0x9f   :  { %v49_v17 = vsel %vm31_vm0, %v45_v13, %v26_v8  ;;  %v50_v18 = vsel %vm32_vm1, %v46_v14, %v27_v9  ;;  %v51_v19 = vsel %vm33_vm2, %v47_v15, %v28_v10  ;;  %v52_v20 = vsel %vm34_vm3, %v48_v16, %v29_v11 }
  0xa0   :  { %53 = vst [vmem:[#allocation6] sm:$0xff] %v49_v17  ;;  %54 = vst [vmem:[#allocation6 + $0x8] sm:$0xff] %v50_v18 }
  0xa1   :  { %55 = vst [vmem:[#allocation6 + $0x10] sm:$0xff] %v51_v19  ;;  %56 = vst [vmem:[#allocation6 + $0x18] sm:$0xff] %v52_v20 }
  0xa2   :  { %109 = shalt.err (!%p106_p12)
}
  0xa3   :  { %s110_s26 = scalar_lea.hbm %s171_s2, 512 }
  0xa4   :  { %p111_p13 = scmp.ne.s32.totalorder %s171_s2, %s110_s26  ;;  %p114_p0 = scmp.lt.u32.totalorder %s110_s26, %s171_s2 }
  0xa6   :  { %p116_p1 = pnand %p114_p0, %p111_p13 }
  0xa8   :  { %119 = shalt.err (!%p116_p1)
}
  0xa9   :  { %66 = dma.vmem_to_hbm [thread:$0]  %s64_s23, 512, %s171_s2, [#allocation5]  }
  0xaa   :  { %122 = dma.done.wait [#allocation5], 512  }
  0xab   :  { %123 = vsyncadd [#allocation5], 4294966784 }
  0xac   :  { %70 = vsyncpa [#allocation4], 1 }
  0xad   :  { %71 = vsyncpa [#allocation5], 1 }

</bundles_post_ra>
